<compile_context>
chip_gen: v5e
topology: v5e:2x2
jax: 0.10.0
libtpu: 0.0.40
codegen_flags: <defaults>
</compile_context>

<pallas_src>
import functools

import jax
import jax.numpy as jnp
import numpy as np
from jax.experimental import pallas as pl
from jax.experimental.pallas import tpu as pltpu


def _pe_add_kernel(x_ref, pe_ref, o_ref, *, batch):
    # x_ref: (ts, B*D); pe_ref: (ts, D) -> replicate along lanes across the batch.
    pe_rep = jnp.tile(pe_ref[...], (1, batch))
    o_ref[...] = (x_ref[...] + pe_rep).astype(o_ref.dtype)


def _pe_add_dropout_kernel(x_ref, pe_ref, bits_ref, o_ref, *, batch, keep_prob):
    pe_rep = jnp.tile(pe_ref[...], (1, batch))
    y = x_ref[...] + pe_rep
    # Inverted dropout with an unsigned integer threshold: keep <=> bits < keep_prob * 2^32.
    thr = jnp.uint32(min(int(round(keep_prob * float(1 << 32))), (1 << 32) - 1))
    keep = bits_ref[...] < thr
    scale = jnp.where(keep,
                      jnp.asarray(1.0 / keep_prob, dtype=y.dtype),
                      jnp.asarray(0.0, dtype=y.dtype))
    o_ref[...] = (y * scale).astype(o_ref.dtype)


def make_positional_encoding_table(d_model, max_len=5000, dtype=jnp.float32):
    """Deterministic sinusoidal PE table, shape (max_len, 1, d_model) (torch layout)."""
    position = jnp.arange(0, max_len, dtype=jnp.float32)[:, None]            # (L, 1)
    div_term = jnp.exp(jnp.arange(0, d_model, 2, dtype=jnp.float32)
                       * (-np.log(10000.0) / d_model))                       # (ceil(D/2),)
    pe = jnp.zeros((max_len, d_model), dtype=jnp.float32)
    pe = pe.at[:, 0::2].set(jnp.sin(position * div_term))
    if d_model % 2 == 1:
        pe = pe.at[:, 1::2].set(jnp.cos(position * div_term[:-1]))
    else:
        pe = pe.at[:, 1::2].set(jnp.cos(position * div_term))
    return pe[:, None, :].astype(dtype)                                      # (L, 1, D)


def _choose_tile_s(seq_len, row_bytes, target_bytes=1 << 20):
    """Largest row-tile dividing seq_len that is a multiple of 8 (or the full
    extent) and keeps one x block around ~1 MiB, so the auto-pipeline gets a
    multi-step grid and double-buffered blocks fit scoped VMEM on v5e/v6e/v7x."""
    if seq_len * row_bytes <= target_bytes:
        return seq_len
    best = 0
    ts = 8
    while ts <= seq_len:
        if seq_len % ts == 0 and ts * row_bytes <= target_bytes:
            best = ts
        ts += 8
    return best if best > 0 else seq_len


def positional_encoding_forward(x, pe, *, dropout_p=0.1, training=False,
                                rng=None, tile_s=None):
    """dropout(x + pe[:S]).  x: (S, B, D); pe: (max_len, 1, D) registered buffer."""
    S, B, D = x.shape
    max_len = pe.shape[0]
    assert S <= max_len

    use_dropout = training and dropout_p > 0.0
    if use_dropout and dropout_p >= 1.0:
        return jnp.zeros_like(x)

    # Lane-dense 2-D views (contiguous reshapes; no HBM copies).
    x2 = x.reshape(S, B * D)
    pe2 = pe.reshape(max_len, D).astype(x.dtype)

    row_bytes = B * D * x.dtype.itemsize
    ts = tile_s if tile_s is not None else _choose_tile_s(S, row_bytes)
    assert S % ts == 0 and (ts % 8 == 0 or ts == S), (S, ts)
    if ts % 8 != 0:
        # Single full-extent block: make the PE block a full-extent dim as well.
        pe2 = pe2[:S]
    grid = (S // ts,)

    x_spec = pl.BlockSpec((ts, B * D), lambda i: (i, 0))
    pe_spec = pl.BlockSpec((ts, D), lambda i: (i, 0))
    bits_spec = pl.BlockSpec((ts, B * D), lambda i: (i, 0))
    out_spec = pl.BlockSpec((ts, B * D), lambda i: (i, 0))
    out_shape = jax.ShapeDtypeStruct((S, B * D), x.dtype)
    cparams = pltpu.CompilerParams(dimension_semantics=("parallel",))

    if not use_dropout:
        out2 = pl.pallas_call(
            functools.partial(_pe_add_kernel, batch=B),
            out_shape=out_shape,
            grid=grid,
            in_specs=[x_spec, pe_spec],
            out_specs=out_spec,
            compiler_params=cparams,
        )(x2, pe2)
    else:
        keep_prob = 1.0 - float(dropout_p)
        key = rng if rng is not None else jax.random.PRNGKey(0)
        bits = jax.random.bits(key, (S, B * D), dtype=jnp.uint32)
        out2 = pl.pallas_call(
            functools.partial(_pe_add_dropout_kernel, batch=B,
                              keep_prob=keep_prob),
            out_shape=out_shape,
            grid=grid,
            in_specs=[x_spec, pe_spec, bits_spec],
            out_specs=out_spec,
            compiler_params=cparams,
        )(x2, pe2, bits)

    return out2.reshape(S, B, D)


if __name__ == "__main__":
    # Small shapes consistent with the module: seq=8, batch=2, d_model=32.
    S, B, D = 8, 2, 32
    MAX_LEN = 64

    key = jax.random.PRNGKey(0)
    x = jax.random.normal(key, (S, B, D), dtype=jnp.float32)
    pe = make_positional_encoding_table(D, max_len=MAX_LEN)

    ref = x + pe[:S]

    # Eval mode (dropout = identity): exact semantics of x + pe[:S].
    out_eval = jax.block_until_ready(
        positional_encoding_forward(x, pe, dropout_p=0.1, training=False))
    np.testing.assert_allclose(np.asarray(out_eval), np.asarray(ref),
                               rtol=1e-6, atol=1e-6)

    # Training mode: kept elements equal (x + pe) / keep_prob, dropped are 0.
    out_train = jax.block_until_ready(
        positional_encoding_forward(x, pe, dropout_p=0.1, training=True,
                                    rng=jax.random.PRNGKey(123)))
    out_np = np.asarray(out_train)
    ref_np = np.asarray(ref)
    kept = out_np != 0.0
    assert kept.any() and (~kept).any()
    np.testing.assert_allclose(out_np[kept], ref_np[kept] / 0.9,
                               rtol=1e-5, atol=1e-5)

    print("KERNEL_OK")
</pallas_src>

<mosaic_0001>
module attributes {stable_mosaic.version = 11 : i64} {
  func.func @_pe_add_kernel(%arg0: i32, %arg1: memref<8x64xf32, #tpu.memory_space<vmem>>, %arg2: memref<8x32xf32, #tpu.memory_space<vmem>>, %arg3: memref<8x64xf32, #tpu.memory_space<vmem>>) attributes {dimension_semantics = [#tpu.dimension_semantics<parallel>], iteration_bounds = array<i64: 1>, scalar_prefetch = 0 : i64, scratch_operands = 0 : i64, tpu.core_type = #tpu.core_type<tc>, window_params = [{transform_indices = @transform_0, window_bounds = array<i64: 8, 64>}, {transform_indices = @transform_1, window_bounds = array<i64: 8, 32>}, {transform_indices = @transform_2, window_bounds = array<i64: 8, 64>}]} {
    %c0 = arith.constant 0 : index
    %c0_0 = arith.constant 0 : index
    %0 = vector.load %arg2[%c0, %c0_0] : memref<8x32xf32, #tpu.memory_space<vmem>>, vector<8x32xf32>
    %1 = tpu.concatenate %0, %0 in 1 : vector<8x32xf32>, vector<8x32xf32> -> vector<8x64xf32>
    %c0_1 = arith.constant 0 : index
    %c0_2 = arith.constant 0 : index
    %2 = vector.load %arg1[%c0_1, %c0_2] : memref<8x64xf32, #tpu.memory_space<vmem>>, vector<8x64xf32>
    %3 = arith.addf %2, %1 : vector<8x64xf32>
    %c0_3 = arith.constant 0 : index
    %c0_4 = arith.constant 0 : index
    %4 = vector.load %arg3[%c0_3, %c0_4] : memref<8x64xf32, #tpu.memory_space<vmem>>, vector<8x64xf32>
    tpu.vector_store %arg3[%c0_3, %c0_4], %3 {strides = array<i32>} : memref<8x64xf32, #tpu.memory_space<vmem>>, vector<8x64xf32>,
    return
  }
  func.func @transform_0(%arg0: i32) -> (i32, i32) {
    %c0_i32 = arith.constant 0 : i32
    %c0_i32_0 = arith.constant 0 : i32
    return %arg0, %c0_i32 : i32, i32
  }
  func.func @transform_1(%arg0: i32) -> (i32, i32) {
    %c0_i32 = arith.constant 0 : i32
    %c0_i32_0 = arith.constant 0 : i32
    return %arg0, %c0_i32 : i32, i32
  }
  func.func @transform_2(%arg0: i32) -> (i32, i32) {
    %c0_i32 = arith.constant 0 : i32
    %c0_i32_0 = arith.constant 0 : i32
    return %arg0, %c0_i32 : i32, i32
  }
}

</mosaic_0001>

<bundles_post_ra>
// kernel: tpu_custom_call.1
= control target key start
LH: loop header
LB: loop body
LE: loop exit
PB: predicated region body
PF: predicated region fallthrough
CT: control target
= control target key end

     0   :  { %s93_s0 = inlined_call_operand.vmem [shape: f32[8,64], index: 0, kind: input, shape index: {}]   ;;  %s94_s1 = inlined_call_operand.vmem [shape: f32[64,32], index: 1, kind: input, shape index: {}]   ;;  %s95_s2 = inlined_call_operand.hbm [shape: f32[8,64], index: 2, kind: output, shape index: {}]  }
   0x1   :  { %v12_v0 = vld [vmem:[%s94_s1] sm:$0xff] }
   0x2   :  { %7 = vsyncpa [#allocation3], 0  ;;  %s67_s11 = smov 32   ;;  %vm17_vm0 = vcmask 261120   ;;  %v19_v1 = vld [vmem:[%s93_s0] sm:$0xff]  ;;  %s68_s14 = smov [#allocation2]  }
   0x3   :  { %14 = vrot.lane.b32.xlu0 %v12_v0, %s67_s11  ;;  %s28_s15 = sshll.u32 %s68_s14, 4  ;;  %s30_s18 = sshll.u32 %s95_s2, 4  ;;  %vm21_vm1 = vcmask 523264   ;;  %s29_s15 = int_to_ptr.vmem [resolvable:$true] %s28_s15  ;;  %s31_s18 = int_to_ptr.hbm [resolvable:$true] %s30_s18 }
  0x75   :  { %v15_v2 = vpop.permute.xlu0 %14 }
  0x76   :  { %v18_v3 = vsel %vm17_vm0, %v12_v0, %v15_v2 }
  0x77   :  { %v20_v4 = vadd.f32 %v19_v1, %v18_v3 }
  0x79   :  { %22 = vst.msk [vmem:[#allocation2] sm:$0xff] %vm21_vm1, %v20_v4 }
  0x7a   :  { %33 = dma.vmem_to_hbm [thread:$0]  %s29_s15, 128, %s31_s18, [#allocation3]  }
  0x7b   :  { %65 = dma.done.wait [#allocation3], 128  }
  0x7c   :  { %66 = vsyncadd [#allocation3], 4294967168 }
  0x7d   :  { %38 = vsyncpa [#allocation3], 1 }

</bundles_post_ra>
